<compile_context>
chip_gen: v6e
topology: v6e:2x2x1
jax: 0.10.0
libtpu: 0.0.40
codegen_flags: <defaults>
</compile_context>

<pallas_src>
import functools
import math

import jax
import jax.numpy as jnp
from jax.experimental import pallas as pl
from jax.experimental.pallas import tpu as pltpu


def _round_up(x, m):
    return ((x + m - 1) // m) * m


def _pick_tile(dim, max_tile, quantum=128):
    """Largest tile <= max_tile dividing dim.

    If dim <= max_tile the full dim is used (a full-extent block is always
    legal). Otherwise dim is assumed to be a multiple of `quantum` and the
    largest multiple of `quantum` dividing dim is returned.
    """
    if dim <= max_tile:
        return dim
    q = dim // quantum
    for m in range(max_tile // quantum, 0, -1):
        if q % m == 0:
            return m * quantum
    return quantum


def _vmem_capacity_bytes():
    """Per-core VMEM capacity; conservative (v7x) fallback if unqueryable."""
    try:
        info = pltpu.get_tpu_info()
        cap = getattr(info, "vmem_capacity_bytes", None)
        if cap:
            return int(cap)
    except Exception:
        pass
    return 64 << 20


def _xw_bias_kernel(x_ref, w_ref, b_ref, o_ref, *, compute_dtype):
    # XW tile = x_tile @ W_tile + bias; f32 MXU accumulation, f32 bias add,
    # then cast to the (typically bf16) dtype consumed by the G @ XW kernel.
    xw = jnp.dot(x_ref[...].astype(compute_dtype),
                 w_ref[...].astype(compute_dtype),
                 preferred_element_type=jnp.float32)
    o_ref[...] = (xw + b_ref[...]).astype(o_ref.dtype)


def _make_g_matmul_kernel(tile_k, xw_resident, compute_dtype, use_acc_scratch):
    """out[i, j] = sum_k G[i, k] @ XW[k, j] with f32 accumulation."""

    def xw_chunk(xw_ref):
        if xw_resident:
            # XW block covers the whole contraction dim; take this step's
            # k-chunk in-kernel (sublane offset is a multiple of tile_k).
            off = pl.multiple_of(pl.program_id(2) * tile_k, tile_k)
            return xw_ref[pl.ds(off, tile_k), :]
        return xw_ref[...]

    def partial_dot(g_ref, xw_ref):
        # G tile is cast to the compute dtype here (stream G from HBM in its
        # stored dtype — no wrapper-side copy).
        return jnp.dot(g_ref[...].astype(compute_dtype),
                       xw_chunk(xw_ref).astype(compute_dtype),
                       preferred_element_type=jnp.float32)

    if use_acc_scratch:
        def kernel(g_ref, xw_ref, o_ref, acc_ref):
            @pl.when(pl.program_id(2) == 0)
            def _init():
                acc_ref[...] = jnp.zeros_like(acc_ref)

            acc_ref[...] += partial_dot(g_ref, xw_ref)

            @pl.when(pl.program_id(2) == pl.num_programs(2) - 1)
            def _finalize():
                o_ref[...] = acc_ref[...].astype(o_ref.dtype)
    else:
        # f32 output: the (i, j) output block is VMEM-resident across the k
        # axis, so accumulate into it directly (no scratch / finalize copy).
        def kernel(g_ref, xw_ref, o_ref):
            @pl.when(pl.program_id(2) == 0)
            def _init():
                o_ref[...] = jnp.zeros_like(o_ref)

            o_ref[...] += partial_dot(g_ref, xw_ref)

    return kernel


def hgnn_conv(x, G, weight, bias=None, *, compute_dtype=jnp.bfloat16,
              max_tile_n=1024, max_tile_k=2048, max_tile_f=512,
              max_single_block=1024):
    """HGNN_conv forward: out = G @ (x @ weight + bias).

    G is streamed in its stored dtype (pass a bf16 G to halve its HBM traffic
    if it is reused across layers/steps). Pass compute_dtype=jnp.float32 for
    full-fidelity f32 arithmetic (XW is then also kept f32).
    """
    N, in_ft = x.shape
    out_ft = weight.shape[1]
    assert G.shape == (N, N)
    assert weight.shape[0] == in_ft
    out_dtype = x.dtype

    # ---- Shape alignment ----------------------------------------------------
    # Feature dim padded to a lane multiple so output stores are lane-dense.
    Fp = _round_up(out_ft, 128)
    # Node dim: avoid copying G whenever possible. A full-extent block is
    # always legal, and any multiple of 128 tiles cleanly; only large,
    # non-128-multiple N pays a zero-pad copy (kept in G's own dtype).
    if N % 128 == 0 or N <= max_single_block:
        Np = N
    else:
        Np = _round_up(N, 128)

    tile_n = _pick_tile(Np, max_tile_n)   # output row tile (G sublane dim)
    tile_k = _pick_tile(Np, max_tile_k)   # contraction tile (G lane dim)
    tile_f = _pick_tile(Fp, max_tile_f)   # output feature tile

    g_isize = jnp.dtype(G.dtype).itemsize
    xw_isize = jnp.dtype(compute_dtype).itemsize
    out_isize = jnp.dtype(out_dtype).itemsize
    use_acc_scratch = out_dtype != jnp.float32

    # ---- Per-generation VMEM budget ------------------------------------------
    vmem_cap = _vmem_capacity_bytes()            # 64 MiB v7x, 128 MiB v5e/v6e
    budget = min(int(vmem_cap * 0.6), 96 << 20)  # ~38 MiB v7x, ~76 MiB v6e

    # Keep XW resident (DMA'd once per feature tile) when it fits comfortably.
    xw_resident = 2 * Np * tile_f * xw_isize <= budget // 3

    def main_usage(tn, tk):
        g_buf = 2 * tn * tk * g_isize                                  # G dbuf
        xw_buf = 2 * (Np if xw_resident else tk) * tile_f * xw_isize   # XW
        out_buf = 2 * tn * tile_f * out_isize                          # out
        acc_buf = tn * tile_f * 4 if use_acc_scratch else 0            # scratch
        return g_buf + xw_buf + out_buf + acc_buf

    # Shrink tiles (contraction tile first) until the working set fits.
    while main_usage(tile_n, tile_k) > budget:
        if tile_k % 256 == 0 and tile_k > 256:
            tile_k //= 2
        elif tile_n % 256 == 0 and tile_n > 256:
            tile_n //= 2
        else:
            break

    # v7x shards the "parallel" axes across 2 TensorCores; with tile_f == Fp
    # the row axis is the only parallel work, so keep >= 4 row blocks.
    while Np // tile_n < 4 and tile_n >= 512 and tile_n % 256 == 0:
        tile_n //= 2

    # ---- Wrapper-side input prep (small arrays; G copied only if padded) -----
    if Np == N:
        Gp, xp = G, x
    else:
        Gp = jnp.pad(G, ((0, Np - N), (0, Np - N)))   # zeros, G's own dtype
        xp = jnp.pad(x, ((0, Np - N), (0, 0)))
    wp = weight if Fp == out_ft else jnp.pad(weight, ((0, 0), (0, Fp - out_ft)))
    b = bias if bias is not None else jnp.zeros((out_ft,), x.dtype)
    b2 = jnp.pad(b, (0, Fp - out_ft)) if Fp != out_ft else b
    b2 = b2.reshape(1, Fp).astype(jnp.float32)
    # Padded XW rows hold the bias, but the matching (explicitly zero) G
    # columns cancel them, so real output rows are unaffected.

    # ---- Prologue: XW = x @ W + b, computed exactly once ---------------------
    tile_r = _pick_tile(Np, 512)
    tile_fp = _pick_tile(Fp, 512)
    pro_usage = (2 * tile_r * in_ft * jnp.dtype(xp.dtype).itemsize
                 + 2 * in_ft * tile_fp * jnp.dtype(wp.dtype).itemsize
                 + 2 * tile_r * tile_fp * xw_isize + 4 * tile_fp)
    # TODO(synk): for very large in_ft (>~8K) add a K grid axis over in_ft
    # instead of keeping it untiled in the prologue.
    xw = pl.pallas_call(
        functools.partial(_xw_bias_kernel, compute_dtype=compute_dtype),
        out_shape=jax.ShapeDtypeStruct((Np, Fp), compute_dtype),
        grid_spec=pltpu.PrefetchScalarGridSpec(
            num_scalar_prefetch=0,
            grid=(Np // tile_r, Fp // tile_fp),
            in_specs=[
                pl.BlockSpec((tile_r, in_ft), lambda m, j: (m, 0)),    # x rows
                pl.BlockSpec((in_ft, tile_fp), lambda m, j: (0, j)),   # weight
                pl.BlockSpec((1, tile_fp), lambda m, j: (0, j)),       # bias
            ],
            out_specs=pl.BlockSpec((tile_r, tile_fp), lambda m, j: (m, j)),
        ),
        compiler_params=pltpu.CompilerParams(
            dimension_semantics=("parallel", "parallel"),
            vmem_limit_bytes=int(min(budget, max(2 * pro_usage, 16 << 20)))),
        cost_estimate=pl.CostEstimate(
            flops=2 * Np * in_ft * Fp,
            transcendentals=0,
            bytes_accessed=(Np * in_ft * jnp.dtype(xp.dtype).itemsize
                            + in_ft * Fp * jnp.dtype(wp.dtype).itemsize
                            + Fp * 4 + Np * Fp * xw_isize)),
    )(xp, wp, b2)

    # ---- Main kernel: out = G @ XW (HBM-bound stream of G) -------------------
    if xw_resident:
        # Block index invariant in i and k -> XW DMA'd once per feature tile.
        xw_spec = pl.BlockSpec((Np, tile_f), lambda i, j, k: (0, j))
        xw_reads = 1
    else:
        xw_spec = pl.BlockSpec((tile_k, tile_f), lambda i, j, k: (k, j))
        xw_reads = Np // tile_n

    scratch = ([pltpu.VMEM((tile_n, tile_f), jnp.float32)]
               if use_acc_scratch else [])
    kernel = _make_g_matmul_kernel(tile_k, xw_resident, compute_dtype,
                                   use_acc_scratch)

    j_blocks = Fp // tile_f   # NB: each extra feature block re-streams all of G
    out = pl.pallas_call(
        kernel,
        out_shape=jax.ShapeDtypeStruct((Np, Fp), out_dtype),
        grid_spec=pltpu.PrefetchScalarGridSpec(
            num_scalar_prefetch=0,
            grid=(Np // tile_n, j_blocks, Np // tile_k),
            in_specs=[
                pl.BlockSpec((tile_n, tile_k), lambda i, j, k: (i, k)),  # G
                xw_spec,                                                 # XW
            ],
            out_specs=pl.BlockSpec((tile_n, tile_f), lambda i, j, k: (i, j)),
            scratch_shapes=scratch,
        ),
        compiler_params=pltpu.CompilerParams(
            dimension_semantics=("parallel", "parallel", "arbitrary"),
            vmem_limit_bytes=int(budget)),
        cost_estimate=pl.CostEstimate(
            flops=2 * Np * Np * Fp,
            transcendentals=0,
            bytes_accessed=(Np * Np * g_isize * j_blocks
                            + Np * Fp * xw_isize * xw_reads
                            + Np * Fp * out_isize)),
    )(Gp, xw)

    return out[:N, :out_ft]


if __name__ == "__main__":
    # Small shapes consistent with the module's forward: x (N, in_ft), G (N, N).
    N, in_ft, out_ft = 16, 32, 64

    key = jax.random.PRNGKey(0)
    kx, kg, kw, kb = jax.random.split(key, 4)

    x = jax.random.normal(kx, (N, in_ft), dtype=jnp.float32)
    G = jax.random.normal(kg, (N, N), dtype=jnp.float32)

    # Deterministic parameter init mirroring reset_parameters():
    # uniform(-stdv, stdv) with stdv = 1 / sqrt(out_ft).
    stdv = 1.0 / math.sqrt(out_ft)
    weight = jax.random.uniform(kw, (in_ft, out_ft), dtype=jnp.float32,
                                minval=-stdv, maxval=stdv)
    bias = jax.random.uniform(kb, (out_ft,), dtype=jnp.float32,
                              minval=-stdv, maxval=stdv)

    out = hgnn_conv(x, G, weight, bias)
    out = jax.block_until_ready(out)
    assert out.shape == (N, out_ft)
    assert out.dtype == jnp.float32

    # Reference mirroring the kernel's bf16-input / f32-accumulate arithmetic.
    bf16 = jnp.bfloat16
    xw_ref = jnp.dot(x.astype(bf16), weight.astype(bf16),
                     preferred_element_type=jnp.float32) + bias
    ref_mirror = jnp.dot(G.astype(bf16), xw_ref.astype(bf16),
                         preferred_element_type=jnp.float32)
    assert jnp.allclose(out, ref_mirror, atol=2e-2, rtol=2e-2)

    # Coarse sanity vs. pure-f32 PyTorch-equivalent math.
    ref_f32 = G @ (x @ weight + bias)
    assert jnp.allclose(out, ref_f32, atol=1e-1, rtol=1e-1)

    print("KERNEL_OK")
</pallas_src>

<mosaic_0001>
module attributes {stable_mosaic.version = 11 : i64} {
  func.func @_xw_bias_kernel(%arg0: i32, %arg1: i32, %arg2: memref<16x32xf32, #tpu.memory_space<vmem>>, %arg3: memref<32x128xf32, #tpu.memory_space<vmem>>, %arg4: memref<1x128xf32, #tpu.memory_space<vmem>>, %arg5: memref<16x128xbf16, #tpu.memory_space<vmem>>) attributes {dimension_semantics = [#tpu.dimension_semantics<parallel>, #tpu.dimension_semantics<parallel>], iteration_bounds = array<i64: 1, 1>, scalar_prefetch = 0 : i64, scratch_operands = 0 : i64, tpu.core_type = #tpu.core_type<tc>, window_params = [{transform_indices = @transform_0, window_bounds = array<i64: 16, 32>}, {transform_indices = @transform_1, window_bounds = array<i64: 32, 128>}, {transform_indices = @transform_2, window_bounds = array<i64: 1, 128>}, {transform_indices = @transform_3, window_bounds = array<i64: 16, 128>}]} {
    %c0 = arith.constant 0 : index
    %c0_0 = arith.constant 0 : index
    %0 = vector.load %arg2[%c0, %c0_0] : memref<16x32xf32, #tpu.memory_space<vmem>>, vector<16x32xf32>
    %1 = arith.truncf %0 : vector<16x32xf32> to vector<16x32xbf16>
    %c0_1 = arith.constant 0 : index
    %c0_2 = arith.constant 0 : index
    %2 = vector.load %arg3[%c0_1, %c0_2] : memref<32x128xf32, #tpu.memory_space<vmem>>, vector<32x128xf32>
    %3 = arith.truncf %2 : vector<32x128xf32> to vector<32x128xbf16>
    %cst = arith.constant dense<0.000000e+00> : vector<16x128xf32>
    %4 = tpu.matmul %1, %3, %cst {dimension_numbers = #tpu.dot_dimension_numbers<[1], [0], [0], [1], [0, 0, 1, 1], [], []>} : vector<16x32xbf16>, vector<32x128xbf16>, vector<16x128xf32> -> vector<16x128xf32>
    %c0_3 = arith.constant 0 : index
    %c0_4 = arith.constant 0 : index
    %5 = vector.load %arg4[%c0_3, %c0_4] : memref<1x128xf32, #tpu.memory_space<vmem>>, vector<1x128xf32>
    %6 = vector.broadcast %5 : vector<1x128xf32> to vector<16x128xf32>
    %7 = arith.addf %4, %6 : vector<16x128xf32>
    %8 = arith.truncf %7 : vector<16x128xf32> to vector<16x128xbf16>
    %c0_5 = arith.constant 0 : index
    %c0_6 = arith.constant 0 : index
    %9 = vector.load %arg5[%c0_5, %c0_6] : memref<16x128xbf16, #tpu.memory_space<vmem>>, vector<16x128xbf16>
    tpu.vector_store %arg5[%c0_5, %c0_6], %8 {strides = array<i32>} : memref<16x128xbf16, #tpu.memory_space<vmem>>, vector<16x128xbf16>,
    return
  }
  func.func @transform_0(%arg0: i32, %arg1: i32) -> (i32, i32) {
    %c0_i32 = arith.constant 0 : i32
    %c0_i32_0 = arith.constant 0 : i32
    return %arg0, %c0_i32 : i32, i32
  }
  func.func @transform_1(%arg0: i32, %arg1: i32) -> (i32, i32) {
    %c0_i32 = arith.constant 0 : i32
    %c0_i32_0 = arith.constant 0 : i32
    return %c0_i32, %arg1 : i32, i32
  }
  func.func @transform_2(%arg0: i32, %arg1: i32) -> (i32, i32) {
    %c0_i32 = arith.constant 0 : i32
    %c0_i32_0 = arith.constant 0 : i32
    return %c0_i32, %arg1 : i32, i32
  }
  func.func @transform_3(%arg0: i32, %arg1: i32) -> (i32, i32) {
    %c0_i32 = arith.constant 0 : i32
    return %arg0, %arg1 : i32, i32
  }
}

</mosaic_0001>

<bundles_post_ra>
// kernel: tpu_custom_call.1
= control target key start
LH: loop header
LB: loop body
LE: loop exit
PB: predicated region body
PF: predicated region fallthrough
CT: control target
= control target key end

     0   :  { %8 = vsyncpa [#allocation3], 0  ;;  %s271_s0 = inlined_call_operand.hbm [shape: f32[16,32], index: 0, kind: input, shape index: {}]   ;;  %s272_s1 = inlined_call_operand.hbm [shape: f32[32,128], index: 1, kind: input, shape index: {}]   ;;  %s273_s2 = inlined_call_operand.vmem [shape: f32[1,128], index: 2, kind: input, shape index: {}]   ;;  %s274_s3 = inlined_call_operand.hbm [shape: bf16[16,128], index: 3, kind: output, shape index: {}]  }
   0x1   :  { %9 = vsyncpa [#allocation6], 0 }
   0x2   :  { %10 = vsyncpa [#allocation4], 0  ;;  %s230_s12 = smov [#allocation2]  }
   0x3   :  { %s16_s13 = sshll.u32 %s230_s12, 4  ;;  %s17_s13 = int_to_ptr.vmem [resolvable:$true] %s16_s13 }
   0x4   :  { %s172_s14 = scalar_lea.vmem %s17_s13, 256  ;;  %p177_p1 = scmp.lt.s32.totalorder %s17_s13, %s17_s13 }
   0x5   :  { %p173_p0 = scmp.ne.s32.totalorder %s17_s13, %s172_s14  ;;  %p178_p2 = scmp.lt.s32.totalorder %s172_s14, %s172_s14 }
   0x7   :  { %p179_p3 = por %p178_p2, %p177_p1 }
   0x9   :  { %p180_p4 = pnand %p179_p3, %p173_p0 }
   0xb   :  { %183 = shalt.err (!%p180_p4)
}
   0xc   :  { %s231_s15 = smov 128   ;;  %s232_s16 = smov 8  }
   0xd   :  { %22 = dma.hbm_to_vmem [thread:$0]  %s271_s0, 256, %s17_s13, [#allocation3], %s231_s15, %s231_s15, %s232_s16  }
   0xe   :  { %s233_s19 = smov [#allocation5]  }
   0xf   :  { %s28_s20 = sshll.u32 %s233_s19, 4  ;;  %s29_s20 = int_to_ptr.vmem [resolvable:$true] %s28_s20 }
  0x10   :  { %s192_s21 = scalar_lea.vmem %s29_s20, 512  ;;  %p197_p6 = scmp.lt.s32.totalorder %s29_s20, %s29_s20 }
  0x11   :  { %p193_p5 = scmp.ne.s32.totalorder %s29_s20, %s192_s21  ;;  %p198_p7 = scmp.lt.s32.totalorder %s192_s21, %s192_s21 }
  0x13   :  { %p199_p8 = por %p198_p7, %p197_p6 }
  0x15   :  { %p200_p9 = pnand %p199_p8, %p193_p5 }
  0x17   :  { %203 = shalt.err (!%p200_p9)
}
  0x18   :  { %34 = dma.hbm_to_vmem [thread:$0]  %s272_s1, 512, %s29_s20, [#allocation6], %s231_s15, %s231_s15, %s232_s16  }
  0x19   :  { %224 = dma.done.wait [#allocation3], 256  }
  0x1a   :  { %225 = vsyncadd [#allocation3], 4294967040 }
  0x1b   :  { %226 = dma.done.wait [#allocation6], 512  }
  0x1c   :  { %227 = vsyncadd [#allocation6], 4294966784  ;;  %v234_v0 = vmov 0.0   ;;  %vm235_vm0 = vmmov 0   ;;  %v49_v1 = vld [vmem:[#allocation5 + $0x10] sm:$0xff]  ;;  %v50_v2 = vld [vmem:[#allocation5 + $0x18] sm:$0xff] }
  0x1d   :  { %147 = vmatprep.subr.bf16.mxu0 %v234_v0  ;;  %151 = vmatprep.mubr.msk.bf16.mxu0 %vm235_vm0, %v234_v0  ;;  %v47_v3 = vld [vmem:[#allocation5] sm:$0xff]  ;;  %v52_v4 = vpack.c.bf16 %v50_v2, %v49_v1  ;;  %v48_v5 = vld [vmem:[#allocation5 + $0x8] sm:$0xff]  ;;  %v44_v7 = vld [vmem:[#allocation2] sm:$0xff]  ;;  %vm60_vm1 = vcmask 261120   ;;  %s236_s24 = smov [#allocation7]  }
  0x1e   :  { %v51_v6 = vpack.c.bf16 %v48_v5, %v47_v3  ;;  %v45_v8 = vld [vmem:[#allocation2 + $0x8] sm:$0xff]  ;;  %v133_v11 = vld [vmem:[%s273_s2] ss:$0 sm:$0xff]  ;;  %s120_s25 = sshll.u32 %s236_s24, 4  ;;  %s121_s25 = int_to_ptr.vmem [resolvable:$true] %s120_s25 }
  0x1f   :  { %148 = vmatpush3.bf16.msra.mxu0 %v52_v4  ;;  %v46_v9 = vpack.c.bf16 %v45_v8, %v44_v7  ;;  %s204_s26 = scalar_lea.vmem %s121_s25, 128  ;;  %p209_p11 = scmp.lt.s32.totalorder %s121_s25, %s121_s25 }
  0x20   :  { %149 = vmatprep.subr.bf16.mxu0 %v234_v0  ;;  %p205_p10 = scmp.ne.s32.totalorder %s121_s25, %s204_s26  ;;  %p210_p12 = scmp.lt.s32.totalorder %s204_s26, %s204_s26 }
  0x22   :  { %p211_p13 = por %p210_p12, %p209_p11 }
  0x23   :  { %150 = vmatpush3.bf16.msra.mxu0 %v51_v6 }
  0x24   :  { %p212_p0 = pnand %p211_p13, %p205_p10 }
  0x26   :  { %152 = vmatmul.mubr.msk.bf16.vlgmr.msra.gmra.mxu0 %vm60_vm1, %v46_v9 }
  0xe6   :  { %v98_v10 = vpop.f32.mrf.mxu0 }
  0xe7   :  { %v99_v14 = vadd.f32 %v133_v11, %v98_v10 }
  0xe8   :  { %v153_v12 = vpop.f32.mrf.mxu0 }
  0xea   :  { %v101_v13 = vpop.f32.mrf.mxu0 }
  0xeb   :  { %v102_v15 = vadd.f32 %v133_v11, %v101_v13 }
  0xec   :  { %v154_v16 = vpop.f32.mrf.mxu0 }
  0xed   :  { %v142_v17 = vpack.c.bf16 %v102_v15, %v99_v14 }
  0xef   :  { %143 = vst [vmem:[#allocation7] sm:$0xff] %v142_v17  }
  0xf0   :  { %215 = shalt.err (!%p212_p0)
}
  0xf1   :  { %s237_s27 = smov 64   ;;  %s238_s28 = smov 4  }
  0xf2   :  { %126 = dma.vmem_to_hbm [thread:$0]  %s121_s25, 128, %s274_s3, [#allocation4], %s237_s27, %s237_s27, %s238_s28  }
  0xf3   :  { %228 = dma.done.wait [#allocation4], 128  }
  0xf4   :  { %229 = vsyncadd [#allocation4], 4294967168 }
  0xf5   :  { %130 = vsyncpa [#allocation3], 1 }
  0xf6   :  { %131 = vsyncpa [#allocation6], 1 }
  0xf7   :  { %132 = vsyncpa [#allocation4], 1 }

</bundles_post_ra>
